<compile_context>
chip_gen: v7x
topology: tpu7x:2x2x1
jax: 0.10.0
libtpu: 0.0.40
codegen_flags: <defaults>
</compile_context>

<pallas_src>
import functools

import jax
import jax.numpy as jnp
from jax.experimental import pallas as pl
from jax.experimental.pallas import tpu as pltpu


def _round_up(x: int, m: int) -> int:
    return ((x + m - 1) // m) * m


def _pad_to(a, axis: int, new_size: int):
    pad = new_size - a.shape[axis]
    if pad == 0:
        return a
    widths = [(0, 0)] * a.ndim
    widths[axis] = (0, pad)
    return jnp.pad(a, widths)


def _expert_mlp_kernel(x_ref, g_ref, u_ref, wd_ref, o_ref, acc_ref):
    """One grid step = (expert e, intermediate tile j)."""
    j = pl.program_id(1)

    @pl.when(j == 0)
    def _init():
        acc_ref[...] = jnp.zeros_like(acc_ref)

    x = x_ref[0]                      # (cap_p, H_p)
    wg = g_ref[0]                     # (H_p, TI)
    wu = u_ref[0]                     # (H_p, TI)
    wd = wd_ref[0]                    # (TI, H_p)

    # Gate / up projections for this intermediate tile; f32 MXU accumulation.
    g = jnp.dot(x, wg, preferred_element_type=jnp.float32)   # (cap_p, TI)
    u = jnp.dot(x, wu, preferred_element_type=jnp.float32)   # (cap_p, TI)
    act = g * jax.nn.sigmoid(g) * u                          # SiLU(g) * u, f32

    # Partial down-projection, accumulated across intermediate tiles.
    acc_ref[...] += jnp.dot(
        act.astype(wd.dtype), wd, preferred_element_type=jnp.float32
    )

    @pl.when(j == pl.num_programs(1) - 1)
    def _finalize():
        o_ref[0] = acc_ref[...].astype(o_ref.dtype)


@functools.partial(jax.jit, static_argnames=("tile_i", "compute_dtype"))
def llama_experts_forward(x_routed, gate_w, up_w, down_w, *,
                          tile_i: int = 512, compute_dtype=None):
    """x_routed: (E, capacity, hidden) -> (E, capacity, hidden).

    gate_w / up_w : (E, hidden, intermediate)   (pre-transposed Linear weights)
    down_w        : (E, intermediate, hidden)
    tile_i        : intermediate tile width (multiple of 128).  Tuning knob:
                    smaller on v7x/v5e (less VMEM), larger on v6e.
    compute_dtype : e.g. jnp.bfloat16 to stream bf16 weights/activations.
    """
    if compute_dtype is not None:
        x_routed = x_routed.astype(compute_dtype)
        gate_w = gate_w.astype(compute_dtype)
        up_w = up_w.astype(compute_dtype)
        down_w = down_w.astype(compute_dtype)
    dt = x_routed.dtype
    el_bytes = jnp.dtype(dt).itemsize

    n_experts, capacity, hidden = x_routed.shape
    intermediate = gate_w.shape[-1]

    # --- padded / tiled sizes -------------------------------------------------
    sublane = 8 if el_bytes == 4 else 16
    cap_p = _round_up(capacity, sublane)
    h_p = _round_up(hidden, 128)
    i_p = _round_up(intermediate, 128)
    ti = _round_up(min(tile_i, i_p), 128)
    i_p = _round_up(i_p, ti)
    n_tiles = i_p // ti

    # --- pad operands (zero padding is exact: padded rows/cols contribute 0) --
    x_p = _pad_to(_pad_to(x_routed, 1, cap_p), 2, h_p)         # (E, cap_p, H_p)
    gate_p = _pad_to(_pad_to(gate_w, 1, h_p), 2, i_p)          # (E, H_p, I_p)
    up_p = _pad_to(_pad_to(up_w, 1, h_p), 2, i_p)              # (E, H_p, I_p)
    down_p = _pad_to(_pad_to(down_w, 1, i_p), 2, h_p)          # (E, I_p, H_p)

    # --- VMEM budget (double-buffered tiles + f32 accumulator) ----------------
    est = 2 * (cap_p * h_p * el_bytes        # x
               + h_p * ti * el_bytes         # gate tile
               + h_p * ti * el_bytes         # up tile
               + ti * h_p * el_bytes         # down tile
               + cap_p * h_p * el_bytes)     # out
    est += cap_p * h_p * 4                   # f32 accumulator
    vmem_limit = min(64 << 20, max(32 << 20, int(est * 1.5)))

    out_p = pl.pallas_call(
        _expert_mlp_kernel,
        out_shape=jax.ShapeDtypeStruct((n_experts, cap_p, h_p), dt),
        grid_spec=pltpu.PrefetchScalarGridSpec(
            num_scalar_prefetch=0,
            grid=(n_experts, n_tiles),
            in_specs=[
                pl.BlockSpec((1, cap_p, h_p), lambda e, j: (e, 0, 0)),   # x
                pl.BlockSpec((1, h_p, ti), lambda e, j: (e, 0, j)),      # gate
                pl.BlockSpec((1, h_p, ti), lambda e, j: (e, 0, j)),      # up
                pl.BlockSpec((1, ti, h_p), lambda e, j: (e, j, 0)),      # down
            ],
            out_specs=pl.BlockSpec((1, cap_p, h_p), lambda e, j: (e, 0, 0)),
            scratch_shapes=[pltpu.VMEM((cap_p, h_p), jnp.float32)],
        ),
        compiler_params=pltpu.CompilerParams(
            dimension_semantics=("parallel", "arbitrary"),
            vmem_limit_bytes=vmem_limit,
        ),
    )(x_p, gate_p, up_p, down_p)

    return out_p[:, :capacity, :hidden]


def _reference_forward(x_routed, gate_w, up_w, down_w):
    """Pure-JAX reference mirroring the PyTorch per-expert loop."""
    g = jnp.einsum("ech,ehi->eci", x_routed, gate_w)
    u = jnp.einsum("ech,ehi->eci", x_routed, up_w)
    h = g * jax.nn.sigmoid(g) * u
    return jnp.einsum("eci,eih->ech", h, down_w)


if __name__ == "__main__":
    # Small, module-consistent shapes (chosen so the intermediate axis is
    # actually tiled: intermediate=256, tile_i=128 -> 2 reduction steps).
    n_experts = 4
    expert_capacity = 8
    hidden_size = 64
    intermediate_size = 256

    key = jax.random.PRNGKey(0)
    kx, kg, ku, kd = jax.random.split(key, 4)

    x_routed = jax.random.normal(
        kx, (n_experts, expert_capacity, hidden_size), dtype=jnp.float32
    )
    scale = 0.05
    gate_w = scale * jax.random.normal(
        kg, (n_experts, hidden_size, intermediate_size), dtype=jnp.float32
    )
    up_w = scale * jax.random.normal(
        ku, (n_experts, hidden_size, intermediate_size), dtype=jnp.float32
    )
    down_w = scale * jax.random.normal(
        kd, (n_experts, intermediate_size, hidden_size), dtype=jnp.float32
    )

    # --- f32 path: exact check against the pure-JAX reference -----------------
    out = llama_experts_forward(x_routed, gate_w, up_w, down_w, tile_i=128)
    out = jax.block_until_ready(out)
    ref = _reference_forward(x_routed, gate_w, up_w, down_w)
    assert out.shape == (n_experts, expert_capacity, hidden_size)
    assert jnp.allclose(out, ref, atol=1e-5, rtol=1e-5), "f32 mismatch vs reference"

    # --- bf16 streaming path: looser tolerance (bf16 weights/activations) -----
    out_bf16 = llama_experts_forward(
        x_routed, gate_w, up_w, down_w, tile_i=128, compute_dtype=jnp.bfloat16
    )
    out_bf16 = jax.block_until_ready(out_bf16)
    ref_bf16 = _reference_forward(
        x_routed.astype(jnp.bfloat16).astype(jnp.float32),
        gate_w.astype(jnp.bfloat16).astype(jnp.float32),
        up_w.astype(jnp.bfloat16).astype(jnp.float32),
        down_w.astype(jnp.bfloat16).astype(jnp.float32),
    )
    assert jnp.allclose(
        out_bf16.astype(jnp.float32), ref_bf16, atol=2e-2, rtol=2e-2
    ), "bf16 mismatch vs reference"

    print("KERNEL_OK")
</pallas_src>

<mosaic_0001>
module attributes {stable_mosaic.version = 11 : i64} {
  func.func @_expert_mlp_kernel(%arg0: i32, %arg1: i32, %arg2: memref<1x8x128xf32, #tpu.memory_space<vmem>>, %arg3: memref<1x128x128xf32, #tpu.memory_space<vmem>>, %arg4: memref<1x128x128xf32, #tpu.memory_space<vmem>>, %arg5: memref<1x128x128xf32, #tpu.memory_space<vmem>>, %arg6: memref<1x8x128xf32, #tpu.memory_space<vmem>>, %arg7: memref<8x128xf32, #tpu.memory_space<vmem>>) attributes {dimension_semantics = [#tpu.dimension_semantics<parallel>, #tpu.dimension_semantics<arbitrary>], iteration_bounds = array<i64: 4, 2>, scalar_prefetch = 0 : i64, scratch_operands = 1 : i64, tpu.core_type = #tpu.core_type<tc>, window_params = [{transform_indices = @transform_0, window_bounds = array<i64: 1, 8, 128>}, {transform_indices = @transform_1, window_bounds = array<i64: 1, 128, 128>}, {transform_indices = @transform_2, window_bounds = array<i64: 1, 128, 128>}, {transform_indices = @transform_3, window_bounds = array<i64: 1, 128, 128>}, {transform_indices = @transform_4, window_bounds = array<i64: 1, 8, 128>}]} {
    %c0_i32 = arith.constant 0 : i32
    %0 = arith.cmpi eq, %arg1, %c0_i32 : i32
    %1 = arith.extui %0 : i1 to i32
    %c0_i32_0 = arith.constant 0 : i32
    %2 = arith.cmpi ne, %1, %c0_i32_0 : i32
    scf.if %2 {
      %cst_20 = arith.constant 0.000000e+00 : f32
      %27 = vector.broadcast %cst_20 : f32 to vector<8x128xf32>
      %c0_21 = arith.constant 0 : index
      %c0_22 = arith.constant 0 : index
      %28 = vector.load %arg7[%c0_21, %c0_22] : memref<8x128xf32, #tpu.memory_space<vmem>>, vector<8x128xf32>
      tpu.vector_store %arg7[%c0_21, %c0_22], %27 {strides = array<i32>} : memref<8x128xf32, #tpu.memory_space<vmem>>, vector<8x128xf32>,
    } else {
    }
    %c0 = arith.constant 0 : index
    %c0_1 = arith.constant 0 : index
    %c0_2 = arith.constant 0 : index
    %3 = vector.load %arg2[%c0, %c0_1, %c0_2] : memref<1x8x128xf32, #tpu.memory_space<vmem>>, vector<1x8x128xf32>
    %4 = vector.shape_cast %3 : vector<1x8x128xf32> to vector<8x128xf32>
    %c0_3 = arith.constant 0 : index
    %c0_4 = arith.constant 0 : index
    %c0_5 = arith.constant 0 : index
    %5 = vector.load %arg3[%c0_3, %c0_4, %c0_5] : memref<1x128x128xf32, #tpu.memory_space<vmem>>, vector<1x128x128xf32>
    %6 = vector.shape_cast %5 : vector<1x128x128xf32> to vector<128x128xf32>
    %c0_6 = arith.constant 0 : index
    %c0_7 = arith.constant 0 : index
    %c0_8 = arith.constant 0 : index
    %7 = vector.load %arg4[%c0_6, %c0_7, %c0_8] : memref<1x128x128xf32, #tpu.memory_space<vmem>>, vector<1x128x128xf32>
    %8 = vector.shape_cast %7 : vector<1x128x128xf32> to vector<128x128xf32>
    %c0_9 = arith.constant 0 : index
    %c0_10 = arith.constant 0 : index
    %c0_11 = arith.constant 0 : index
    %9 = vector.load %arg5[%c0_9, %c0_10, %c0_11] : memref<1x128x128xf32, #tpu.memory_space<vmem>>, vector<1x128x128xf32>
    %10 = vector.shape_cast %9 : vector<1x128x128xf32> to vector<128x128xf32>
    %cst = arith.constant dense<0.000000e+00> : vector<8x128xf32>
    %11 = tpu.matmul %4, %6, %cst {dimension_numbers = #tpu.dot_dimension_numbers<[1], [0], [0], [1], [0, 0, 1, 1], [], []>} : vector<8x128xf32>, vector<128x128xf32>, vector<8x128xf32> -> vector<8x128xf32>
    %cst_12 = arith.constant dense<0.000000e+00> : vector<8x128xf32>
    %12 = tpu.matmul %4, %8, %cst_12 {dimension_numbers = #tpu.dot_dimension_numbers<[1], [0], [0], [1], [0, 0, 1, 1], [], []>} : vector<8x128xf32>, vector<128x128xf32>, vector<8x128xf32> -> vector<8x128xf32>
    %13 = arith.negf %11 : vector<8x128xf32>
    %14 = math.exp %13 : vector<8x128xf32>
    %cst_13 = arith.constant 1.000000e+00 : f32
    %15 = vector.broadcast %cst_13 : f32 to vector<8x128xf32>
    %16 = arith.addf %15, %14 : vector<8x128xf32>
    %17 = arith.divf %15, %16 : vector<8x128xf32>
    %18 = arith.mulf %11, %17 : vector<8x128xf32>
    %19 = arith.mulf %18, %12 : vector<8x128xf32>
    %c0_14 = arith.constant 0 : index
    %c0_15 = arith.constant 0 : index
    %20 = vector.load %arg7[%c0_14, %c0_15] : memref<8x128xf32, #tpu.memory_space<vmem>>, vector<8x128xf32>
    %cst_16 = arith.constant dense<0.000000e+00> : vector<8x128xf32>
    %21 = tpu.matmul %19, %10, %cst_16 {dimension_numbers = #tpu.dot_dimension_numbers<[1], [0], [0], [1], [0, 0, 1, 1], [], []>} : vector<8x128xf32>, vector<128x128xf32>, vector<8x128xf32> -> vector<8x128xf32>
    %22 = arith.addf %20, %21 : vector<8x128xf32>
    %c0_17 = arith.constant 0 : index
    %c0_18 = arith.constant 0 : index
    %23 = vector.load %arg7[%c0_17, %c0_18] : memref<8x128xf32, #tpu.memory_space<vmem>>, vector<8x128xf32>
    tpu.vector_store %arg7[%c0_17, %c0_18], %22 {strides = array<i32>} : memref<8x128xf32, #tpu.memory_space<vmem>>, vector<8x128xf32>,
    %c1_i32 = arith.constant 1 : i32
    %24 = arith.cmpi eq, %arg1, %c1_i32 : i32
    %25 = arith.extui %24 : i1 to i32
    %c0_i32_19 = arith.constant 0 : i32
    %26 = arith.cmpi ne, %25, %c0_i32_19 : i32
    scf.if %26 {
      %c0_20 = arith.constant 0 : index
      %c0_21 = arith.constant 0 : index
      %27 = vector.load %arg7[%c0_20, %c0_21] : memref<8x128xf32, #tpu.memory_space<vmem>>, vector<8x128xf32>
      %c0_22 = arith.constant 0 : index
      %c0_23 = arith.constant 0 : index
      %c0_24 = arith.constant 0 : index
      %28 = vector.load %arg6[%c0_22, %c0_23, %c0_24] : memref<1x8x128xf32, #tpu.memory_space<vmem>>, vector<1x8x128xf32>
      %29 = vector.shape_cast %28 : vector<1x8x128xf32> to vector<8x128xf32>
      %30 = vector.shape_cast %27 : vector<8x128xf32> to vector<1x8x128xf32>
      tpu.vector_store %arg6[%c0_22, %c0_23, %c0_24], %30 {strides = array<i32>} : memref<1x8x128xf32, #tpu.memory_space<vmem>>, vector<1x8x128xf32>,
    } else {
    }
    return
  }
  func.func @transform_0(%arg0: i32, %arg1: i32) -> (i32, i32, i32) {
    %c0_i32 = arith.constant 0 : i32
    %c0_i32_0 = arith.constant 0 : i32
    %c0_i32_1 = arith.constant 0 : i32
    return %arg0, %c0_i32, %c0_i32_0 : i32, i32, i32
  }
  func.func @transform_1(%arg0: i32, %arg1: i32) -> (i32, i32, i32) {
    %c0_i32 = arith.constant 0 : i32
    %c0_i32_0 = arith.constant 0 : i32
    return %arg0, %c0_i32, %arg1 : i32, i32, i32
  }
  func.func @transform_2(%arg0: i32, %arg1: i32) -> (i32, i32, i32) {
    %c0_i32 = arith.constant 0 : i32
    %c0_i32_0 = arith.constant 0 : i32
    return %arg0, %c0_i32, %arg1 : i32, i32, i32
  }
  func.func @transform_3(%arg0: i32, %arg1: i32) -> (i32, i32, i32) {
    %c0_i32 = arith.constant 0 : i32
    %c0_i32_0 = arith.constant 0 : i32
    return %arg0, %arg1, %c0_i32 : i32, i32, i32
  }
  func.func @transform_4(%arg0: i32, %arg1: i32) -> (i32, i32, i32) {
    %c0_i32 = arith.constant 0 : i32
    %c0_i32_0 = arith.constant 0 : i32
    %c0_i32_1 = arith.constant 0 : i32
    return %arg0, %c0_i32, %c0_i32_0 : i32, i32, i32
  }
}

</mosaic_0001>

<bundles_post_ra>
// kernel: llama_experts_forward.1
= control target key start
LH: loop header
LB: loop body
LE: loop exit
PB: predicated region body
PF: predicated region fallthrough
CT: control target
= control target key end

     0   :  { %s1703_s0 = inlined_call_operand.vmem [shape: f32[4,8,128], index: 0, kind: input, shape index: {}]   ;;  %s1704_s1 = inlined_call_operand.vmem [shape: f32[4,128,256], index: 1, kind: input, shape index: {}]   ;;  %s1705_s2 = inlined_call_operand.vmem [shape: f32[4,128,256], index: 2, kind: input, shape index: {}]   ;;  %s1706_s3 = inlined_call_operand.vmem [shape: f32[4,256,128], index: 3, kind: input, shape index: {}]   ;;  %s1707_s4 = inlined_call_operand.hbm [shape: f32[4,8,128], index: 4, kind: output, shape index: {}]  }
   0x1   :  { %1713 = sst [smem:[#allocation12_spill]] %s1704_s1 }
   0x2   :  { %1714 = sst [smem:[#allocation13_spill]] %s1705_s2 }
   0x3   :  { %9 = vsyncpa [#allocation6], 0 }
   0x4   :  { %11 = vsyncpa [#allocation6 + $0x1], 0  ;;  %s1390_s15 = smov 0   ;;  %s1392_s16 = smov 0  }
   0x5   :  { %s1394_s17 = smov 0   ;;  %s1396_s18 = smov 0  }
   0x6   :  { %s1398_s19 = smov 0   ;;  %s1400_s20 = smov 0  }
   0x7   :  { %s1402_s21 = smov 0   ;;  %s1404_s22 = smov 0  }
   0x8   :  { %s1406_s23 = smov 0   ;;  %s1408_s24 = smov 0  }
   0x9 LB: > { %1715 = sst [smem:[#allocation8_spill]] %s1350_s22  ;;  %s900_s25 = sadd.s32 4294967295, %s1358_s24   ;;  %s1358_s24 = sphi %s1408_s24, %s17_s24   ;;  %s1354_s23 = sphi %s1406_s23, %s1728_s23   ;;  %s1350_s22 = sphi %s1404_s22, %s1727_s22   ;;  %s1346_s21 = sphi %s1402_s21, %s1726_s21   ;;  %s1342_s20 = sphi %s1400_s20, %s1725_s20   ;;  %s1338_s19 = sphi %s1398_s19, %s1733_s19   ;;  %s1334_s18 = sphi %s1396_s18, %s1732_s18   ;;  %s1330_s17 = sphi %s1394_s17, %s1731_s17   ;;  %s1326_s16 = sphi %s1392_s16, %s1730_s16   ;;  %s1322_s15 = sphi %s1390_s15, %s1729_s15  }
   0xa   : > { %1716 = sst [smem:[#allocation9_spill]] %s1354_s23  ;;  %s901_s26 = sadd.s32 4294967294, %s1358_s24  }
   0xb   : > { %s26_s27 = sadd.s32 1, %s1350_s22  ;;  %s29_s28 = sadd.s32 1, %s1354_s23 }
   0xc   : > { %p27_p0 = scmp.ge.s32.totalorder %s26_s27, 2  ;;  %s64_s29 = sadd.s32 1, %s1338_s19 }
   0xd   : > { %p71_p1 = scmp.ne.s32.totalorder %s1338_s19, %s1334_s18  ;;  %p72_p2 = scmp.eq.s32.totalorder %s1358_s24, 0 }
   0xe   : > { %s1735_s27 = smov (%p27_p0, %s26_s27), 0  ;;  %s1737_s28 = smov (!%p27_p0, %s29_s28), %s1354_s23 }
   0xf   : > { %1717 = sst [smem:[#allocation10_spill]] %s1735_s27  ;;  %s60_s30 = ssub.s32 %s1350_s22, %s1735_s27 }
  0x10   : > { %p1453_p3 = por %p72_p2, %p71_p1  ;;  %p31_p4 = scmp.ge.s32.totalorder %s1737_s28, 4 }
  0x11   : > { %s146_s6 = sadd.s32 1, %s1330_s17  ;;  %p156_p5 = scmp.ne.s32.totalorder %s1330_s17, %s1326_s16 }
  0x12   : > { %p157_p6 = scmp.eq.s32.totalorder %s900_s25, 7  ;;  %s1739_s28 = smov (%p31_p4, %s1737_s28), 0 }
  0x13   : > { %1719 = sst [smem:[#allocation11_spill]] %s1739_s28  ;;  %p162_p8 = scmp.ne.s32.totalorder %s1326_s16, %s1322_s15 }
  0x14   : > { %p1462_p7 = por %p157_p6, %p156_p5  ;;  %s59_s8 = ssub.s32 %s1354_s23, %s1739_s28 }
  0x15   : > { %p163_p9 = scmp.eq.s32.totalorder %s901_s26, 7  ;;  %s61_s9 = sor.u32 %s60_s30, %s59_s8 }
  0x16   : > { %p144_p10 = scmp.eq.s32.totalorder %s59_s8, 0  ;;  %p62_p11 = scmp.eq.s32.totalorder %s61_s9, 0 }
  0x17   : > { %p1470_p12 = por %p163_p9, %p162_p8  ;;  %p903_p13 = scmp.ge.s32.totalorder %s1358_s24, 8 }
  0x18   : > { %s1475_s11 = scalar_select %p144_p10, %s1330_s17, %s146_s6  }
  0x19   : > { %s1478_s12 = scalar_select %p62_p11, %s1338_s19, %s64_s29  }
  0x1a   : > { %179 = sbr.rel (%p903_p13) target bundleno = 69 (0x45), region = 16 }
  0x21   : > { %189 = sbr.rel (!%p1453_p3) target bundleno = 51 (0x33), region = 24  ;;  %s191_s13 = sand.u32 (%p1453_p3), 1, %s1338_s19  }
  0x22   : > { %s905_s14 = sshll.u32 (%p1453_p3), %s1354_s23, 5  ;;  %s904_s25 = sshll.u32 (%p1453_p3), %s191_s13, 7 }
  0x23   : > { %s195_s26 = sadd.s32 (%p1453_p3), %s1350_s22, %s905_s14  ;;  %s1722_s1 = sld [smem:[#allocation12_spill]] (%p1453_p3) }
  0x24   : > { %s906_s30 = sshll.u32 (%p1453_p3), %s195_s26, 3  ;;  %s193_s29 = scalar_lea.vmem (%p1453_p3), [#allocation3], %s904_s25 }
  0x29   : > { %s1489_s6 = scalar_lea.vmem %s1722_s1, %s906_s30 }
  0x2a   : > { %v255_v0 = vld [vmem:[%s1489_s6] sm:$0xff]  ;;  %v257_v1 = vld [vmem:[%s1489_s6 + $0x10] sm:$0xff] }
  0x2b   : > { %v259_v2 = vld [vmem:[%s1489_s6 + $0x20] sm:$0xff]  ;;  %256 = vst [vmem:[%s193_s29] sm:$0xff] %v255_v0  ;;  %258 = vst [vmem:[%s193_s29 + $0x8] sm:$0xff] %v257_v1  ;;  %v261_v3 = vld [vmem:[%s1489_s6 + $0x30] sm:$0xff] }
  0x2c   : > { %260 = vst [vmem:[%s193_s29 + $0x10] sm:$0xff] %v259_v2  ;;  %v263_v4 = vld [vmem:[%s1489_s6 + $0x40] sm:$0xff]  ;;  %v265_v5 = vld [vmem:[%s1489_s6 + $0x50] sm:$0xff]  ;;  %262 = vst [vmem:[%s193_s29 + $0x18] sm:$0xff] %v261_v3 }
  0x2d   : > { %264 = vst [vmem:[%s193_s29 + $0x20] sm:$0xff] %v263_v4  ;;  %266 = vst [vmem:[%s193_s29 + $0x28] sm:$0xff] %v265_v5  ;;  %v267_v6 = vld [vmem:[%s1489_s6 + $0x60] sm:$0xff]  ;;  %v269_v7 = vld [vmem:[%s1489_s6 + $0x70] sm:$0xff] }
  0x2e   : > { %v271_v8 = vld [vmem:[%s1489_s6 + $0x80] sm:$0xff]  ;;  %268 = vst [vmem:[%s193_s29 + $0x30] sm:$0xff] %v267_v6  ;;  %270 = vst [vmem:[%s193_s29 + $0x38] sm:$0xff] %v269_v7  ;;  %v273_v9 = vld [vmem:[%s1489_s6 + $0x90] sm:$0xff] }
  0x2f   : > { %272 = vst [vmem:[%s193_s29 + $0x40] sm:$0xff] %v271_v8  ;;  %v275_v10 = vld [vmem:[%s1489_s6 + $0xa0] sm:$0xff]  ;;  %v277_v11 = vld [vmem:[%s1489_s6 + $0xb0] sm:$0xff]  ;;  %274 = vst [vmem:[%s193_s29 + $0x48] sm:$0xff] %v273_v9 }
  0x30   : > { %276 = vst [vmem:[%s193_s29 + $0x50] sm:$0xff] %v275_v10  ;;  %278 = vst [vmem:[%s193_s29 + $0x58] sm:$0xff] %v277_v11  ;;  %v279_v12 = vld [vmem:[%s1489_s6 + $0xc0] sm:$0xff]  ;;  %v281_v13 = vld [vmem:[%s1489_s6 + $0xd0] sm:$0xff] }
  0x31   : > { %v283_v14 = vld [vmem:[%s1489_s6 + $0xe0] sm:$0xff]  ;;  %280 = vst [vmem:[%s193_s29 + $0x60] sm:$0xff] %v279_v12  ;;  %282 = vst [vmem:[%s193_s29 + $0x68] sm:$0xff] %v281_v13  ;;  %v285_v15 = vld [vmem:[%s1489_s6 + $0xf0] sm:$0xff] }
  0x32   : > { %284 = vst [vmem:[%s193_s29 + $0x70] sm:$0xff] %v283_v14  ;;  %286 = vst [vmem:[%s193_s29 + $0x78] sm:$0xff] %v285_v15 }
  0x33 PF: > { %292 = sbr.rel (!%p1453_p3) target bundleno = 69 (0x45), region = 62  ;;  %s294_s13 = sand.u32 (%p1453_p3), 1, %s1338_s19  }
  0x34   : > { %s908_s14 = sshll.u32 (%p1453_p3), %s1354_s23, 5  ;;  %s907_s25 = sshll.u32 (%p1453_p3), %s294_s13, 7 }
  0x35   : > { %s298_s26 = sadd.s32 (%p1453_p3), %s1350_s22, %s908_s14  ;;  %s1723_s2 = sld [smem:[#allocation13_spill]] (%p1453_p3) }
  0x36   : > { %s909_s30 = sshll.u32 (%p1453_p3), %s298_s26, 3  ;;  %s296_s5 = scalar_lea.vmem (%p1453_p3), [#allocation4], %s907_s25 }
  0x3b   : > { %s1515_s1 = scalar_lea.vmem %s1723_s2, %s909_s30 }
  0x3c   : > { %v358_v16 = vld [vmem:[%s1515_s1] sm:$0xff]  ;;  %v360_v17 = vld [vmem:[%s1515_s1 + $0x10] sm:$0xff] }
  0x3d   : > { %v362_v18 = vld [vmem:[%s1515_s1 + $0x20] sm:$0xff]  ;;  %359 = vst [vmem:[%s296_s5] sm:$0xff] %v358_v16  ;;  %361 = vst [vmem:[%s296_s5 + $0x8] sm:$0xff] %v360_v17  ;;  %v364_v19 = vld [vmem:[%s1515_s1 + $0x30] sm:$0xff] }
  0x3e   : > { %363 = vst [vmem:[%s296_s5 + $0x10] sm:$0xff] %v362_v18  ;;  %v366_v20 = vld [vmem:[%s1515_s1 + $0x40] sm:$0xff]  ;;  %v368_v21 = vld [vmem:[%s1515_s1 + $0x50] sm:$0xff]  ;;  %365 = vst [vmem:[%s296_s5 + $0x18] sm:$0xff] %v364_v19 }
  0x3f   : > { %367 = vst [vmem:[%s296_s5 + $0x20] sm:$0xff] %v366_v20  ;;  %369 = vst [vmem:[%s296_s5 + $0x28] sm:$0xff] %v368_v21  ;;  %v370_v22 = vld [vmem:[%s1515_s1 + $0x60] sm:$0xff]  ;;  %v372_v23 = vld [vmem:[%s1515_s1 + $0x70] sm:$0xff] }
  0x40   : > { %v374_v24 = vld [vmem:[%s1515_s1 + $0x80] sm:$0xff]  ;;  %371 = vst [vmem:[%s296_s5 + $0x30] sm:$0xff] %v370_v22  ;;  %373 = vst [vmem:[%s296_s5 + $0x38] sm:$0xff] %v372_v23  ;;  %v376_v25 = vld [vmem:[%s1515_s1 + $0x90] sm:$0xff] }
  0x41   : > { %375 = vst [vmem:[%s296_s5 + $0x40] sm:$0xff] %v374_v24  ;;  %v378_v26 = vld [vmem:[%s1515_s1 + $0xa0] sm:$0xff]  ;;  %v380_v27 = vld [vmem:[%s1515_s1 + $0xb0] sm:$0xff]  ;;  %377 = vst [vmem:[%s296_s5 + $0x48] sm:$0xff] %v376_v25 }
  0x42   : > { %379 = vst [vmem:[%s296_s5 + $0x50] sm:$0xff] %v378_v26  ;;  %381 = vst [vmem:[%s296_s5 + $0x58] sm:$0xff] %v380_v27  ;;  %v382_v28 = vld [vmem:[%s1515_s1 + $0xc0] sm:$0xff]  ;;  %v384_v29 = vld [vmem:[%s1515_s1 + $0xd0] sm:$0xff] }
  0x43   : > { %v386_v30 = vld [vmem:[%s1515_s1 + $0xe0] sm:$0xff]  ;;  %383 = vst [vmem:[%s296_s5 + $0x60] sm:$0xff] %v382_v28  ;;  %385 = vst [vmem:[%s296_s5 + $0x68] sm:$0xff] %v384_v29  ;;  %v388_v31 = vld [vmem:[%s1515_s1 + $0xf0] sm:$0xff] }
  0x44   : > { %387 = vst [vmem:[%s296_s5 + $0x70] sm:$0xff] %v386_v30  ;;  %389 = vst [vmem:[%s296_s5 + $0x78] sm:$0xff] %v388_v31 }
  0x45 PF: > { %p910_p0 = scmp.ge.s32.totalorder %s1358_s24, 1  ;;  %p407_p1 = scmp.lt.s32.totalorder %s1358_s24, 9 }
  0x47   : > { %p408_p2 = pnand %p910_p0, %p407_p1 }
  0x48   : > { %s414_s6 = sand.u32 (!%p408_p2), 1, %s1334_s18   ;;  %s1709_s29 = sand.u32 (!%p408_p2), 1, %s1326_s16  }
  0x49   : > { %411 = sbr.rel (%p408_p2) target bundleno = 612 (0x264), region = 104  ;;  %s911_s13 = sshll.u32 (!%p408_p2), %s414_s6, 7 }
  0x4a   : > { %s1539_s1 = sshll.u32 (!%p408_p2), %s1709_s29, 3  ;;  %p463_p3 = scmp.lt.s32.totalorder (!%p408_p2), %s1346_s21, 3 }
  0x4b   : > { %s915_s14 = sshll.u32 (!%p408_p2), %s1342_s20, 4  ;;  %s1554_s27 = scalar_lea.vmem (!%p408_p2), [#allocation3], %s911_s13 }
  0x4c   : > { %p470_p4 = scmp.lt.s32.totalorder (!%p408_p2), %s915_s14, 31  ;;  %s1556_s23 = scalar_lea.vmem (!%p408_p2), [#allocation4], %s911_s13 }
  0x4d   : > { %s462_s22 = scalar_lea.vmem (!%p408_p2), [#allocation5], %s1539_s1  ;;  %p918_p5 = scmp.ne.s32.totalorder (!%p408_p2), %s1342_s20, 0 }
  0x50   : > { %s464_s25 = scalar_select %p463_p3, %s1346_s21, 3 }
  0x51   : > { %s1741_s14 = smov (!%p470_p4, %s915_s14), 31  ;;  %480 = sbr.rel (%p918_p5) target bundleno = 88 (0x58), region = 116 }
  0x52   : > { %s914_s26 = sshll.u32 %s464_s25, 3  ;;  %s916_s5 = sshll.u32 %s464_s25, 5  ;;  %v1360_v32 = vmov (!%p918_p5), 0.0  }
  0x53   : > { %s1547_s9 = scalar_lea.vmem %s1703_s0, %s914_s26  ;;  %s473_s2 = sadd.s32 %s916_s5, %s1741_s14  ;;  %481 = vst [vmem:[#allocation2] sm:$0xff] (!%p918_p5), %v1360_v32 }
  0x54   : > { %s917_s18 = sshll.u32 %s473_s2, 3 }
  0x55   : > { %s1552_s29 = scalar_lea.vmem %s1706_s3, %s917_s18 }
  0x58 PF: > { %v483_v33 = vld [vmem:[%s1554_s27] sm:$0xff]  ;;  %v484_v34 = vld [vmem:[%s1554_s27 + $0x8] sm:$0xff]  ;;  %v485_v35 = vld [vmem:[%s1554_s27 + $0x10] sm:$0xff]  ;;  %v1361_v36 = vmov 0.0|0.0   ;;  %vm1362_vm0 = vmmov 0   ;;  %v1363_v39 = vmov 0.0  }
  0x59   : > { %1081 = vmatprep.subr.bf16.mxu0 %v1361_v36  ;;  %v1082_v37 = vpack.c.bf16 %v484_v34, %v483_v33  ;;  %v486_v38 = vld [vmem:[%s1554_s27 + $0x18] sm:$0xff]  ;;  %1105 = vmatprep.subr.bf16.mxu1 %v1361_v36  ;;  %v487_v41 = vld [vmem:[%s1554_s27 + $0x20] sm:$0xff]  ;;  %v488_v42 = vld [vmem:[%s1554_s27 + $0x28] sm:$0xff]  ;;  %p920_p6 = scmp.ne.s32.totalorder %s1342_s20, 1 }
  0x5a   : > { %1008 = vmatprep.mubr.msk.f32.mxu0 %vm1362_vm0, %v1363_v39  ;;  %1043 = vmatprep.mubr.msk.f32.mxu1 %vm1362_vm0, %v1363_v39  ;;  %v1085_v40 = vpack.c.bf16 %v486_v38, %v485_v35  ;;  %v499_v43 = vld [vmem:[%s1556_s23] sm:$0xff]  ;;  %v500_v44 = vld [vmem:[%s1556_s23 + $0x8] sm:$0xff]  ;;  %v501_v46 = vld [vmem:[%s1556_s23 + $0x10] sm:$0xff]  ;;  %v1088_v48 = vpack.c.bf16 %v488_v42, %v487_v41 }
  0x5b   : > { %1083 = vmatpush3.bf16.msra.mxu0 %v1082_v37  ;;  %v1106_v45 = vpack.c.bf16 %v500_v44, %v499_v43  ;;  %v502_v47 = vld [vmem:[%s1556_s23 + $0x18] sm:$0xff]  ;;  %v489_v49 = vld [vmem:[%s1554_s27 + $0x30] sm:$0xff]  ;;  %v503_v52 = vld [vmem:[%s1556_s23 + $0x20] sm:$0xff] }
  0x5c   : > { %1084 = vmatprep.subr.bf16.mxu0 %v1361_v36  ;;  %v490_v50 = vld [vmem:[%s1554_s27 + $0x38] sm:$0xff]  ;;  %v1109_v51 = vpack.c.bf16 %v502_v47, %v501_v46  ;;  %v504_v53 = vld [vmem:[%s1556_s23 + $0x28] sm:$0xff]  ;;  %v491_v55 = vld [vmem:[%s1554_s27 + $0x40] sm:$0xff] }
  0x5d   : > { %1107 = vmatpush3.bf16.msra.mxu1 %v1106_v45  ;;  %v1091_v54 = vpack.c.bf16 %v490_v50, %v489_v49  ;;  %v492_v56 = vld [vmem:[%s1554_s27 + $0x48] sm:$0xff]  ;;  %v1112_v57 = vpack.c.bf16 %v504_v53, %v503_v52  ;;  %v505_v58 = vld [vmem:[%s1556_s23 + $0x30] sm:$0xff]  ;;  %v506_v59 = vld [vmem:[%s1556_s23 + $0x38] sm:$0xff] }
  0x5e   : > { %1108 = vmatprep.subr.bf16.mxu1 %v1361_v36  ;;  %v1094_v60 = vpack.c.bf16 %v492_v56, %v491_v55  ;;  %v493_v61 = vld [vmem:[%s1554_s27 + $0x50] sm:$0xff]  ;;  %v494_v62 = vld [vmem:[%s1554_s27 + $0x58] sm:$0xff]  ;;  %v1115_v63 = vpack.c.bf16 %v506_v59, %v505_v58  ;;  %v507_v0 = vld [vmem:[%s1556_s23 + $0x40] sm:$0xff] }
  0x5f   : > { %1086 = vmatpush3.bf16.msra.mxu0 %v1085_v40  ;;  %v508_v1 = vld [vmem:[%s1556_s23 + $0x48] sm:$0xff]  ;;  %v1097_v2 = vpack.c.bf16 %v494_v62, %v493_v61  ;;  %v495_v3 = vld [vmem:[%s1554_s27 + $0x60] sm:$0xff]  ;;  %v509_v6 = vld [vmem:[%s1556_s23 + $0x50] sm:$0xff] }
  0x60   : > { %1087 = vmatprep.subr.bf16.mxu0 %v1361_v36  ;;  %v496_v4 = vld [vmem:[%s1554_s27 + $0x68] sm:$0xff]  ;;  %v1118_v5 = vpack.c.bf16 %v508_v1, %v507_v0  ;;  %v510_v7 = vld [vmem:[%s1556_s23 + $0x58] sm:$0xff]  ;;  %v497_v9 = vld [vmem:[%s1554_s27 + $0x70] sm:$0xff] }
  0x61   : > { %1110 = vmatpush3.bf16.msra.mxu1 %v1109_v51  ;;  %v1100_v8 = vpack.c.bf16 %v496_v4, %v495_v3  ;;  %v498_v10 = vld [vmem:[%s1554_s27 + $0x78] sm:$0xff]  ;;  %v1121_v11 = vpack.c.bf16 %v510_v7, %v509_v6  ;;  %v511_v12 = vld [vmem:[%s1556_s23 + $0x60] sm:$0xff]  ;;  %v512_v13 = vld [vmem:[%s1556_s23 + $0x68] sm:$0xff] }
  0x62   : > { %1111 = vmatprep.subr.bf16.mxu1 %v1361_v36  ;;  %v1103_v14 = vpack.c.bf16 %v498_v10, %v497_v9  ;;  %v1124_v15 = vpack.c.bf16 %v512_v13, %v511_v12  ;;  %v513_v16 = vld [vmem:[%s1556_s23 + $0x70] sm:$0xff]  ;;  %v514_v17 = vld [vmem:[%s1556_s23 + $0x78] sm:$0xff]  ;;  %v516_v21 = vld [vmem:[%s1552_s29 + $0x8] sm:$0xff] }
  0x63   : > { %1089 = vmatpush3.bf16.msra.mxu0 %v1088_v48  ;;  %v482_v18 = vld [vmem:[%s1547_s9] sm:$0xff]  ;;  %v1127_v19 = vpack.c.bf16 %v514_v17, %v513_v16  ;;  %v517_v23 = vld [vmem:[%s1552_s29 + $0x10] sm:$0xff]  ;;  %v518_v24 = vld [vmem:[%s1552_s29 + $0x18] sm:$0xff] }
  0x64   : > { %1090 = vmatprep.subr.bf16.mxu0 %v1361_v36  ;;  %v515_v20 = vld [vmem:[%s1552_s29] sm:$0xff]  ;;  %v1133_v25 = vpack.c.bf16 %v518_v24, %v517_v23  ;;  %v520_v27 = vld [vmem:[%s1552_s29 + $0x28] sm:$0xff]  ;;  %v521_v29 = vld [vmem:[%s1552_s29 + $0x30] sm:$0xff] }
  0x65   : > { %1113 = vmatpush3.bf16.msra.mxu1 %v1112_v57  ;;  %v1130_v22 = vpack.c.bf16 %v516_v21, %v515_v20  ;;  %v519_v26 = vld [vmem:[%s1552_s29 + $0x20] sm:$0xff]  ;;  %v522_v30 = vld [vmem:[%s1552_s29 + $0x38] sm:$0xff]  ;;  %v524_v33 = vld [vmem:[%s1552_s29 + $0x48] sm:$0xff] }
  0x66   : > { %1114 = vmatprep.subr.bf16.mxu1 %v1361_v36  ;;  %v1136_v28 = vpack.c.bf16 %v520_v27, %v519_v26  ;;  %v1139_v31 = vpack.c.bf16 %v522_v30, %v521_v29  ;;  %v523_v32 = vld [vmem:[%s1552_s29 + $0x40] sm:$0xff]  ;;  %v525_v35 = vld [vmem:[%s1552_s29 + $0x50] sm:$0xff]  ;;  %v526_v37 = vld [vmem:[%s1552_s29 + $0x58] sm:$0xff] }
  0x67   : > { %1092 = vmatpush3.bf16.msra.mxu0 %v1091_v54  ;;  %v1142_v34 = vpack.c.bf16 %v524_v33, %v523_v32  ;;  %v1145_v38 = vpack.c.bf16 %v526_v37, %v525_v35  ;;  %v528_v40 = vld [vmem:[%s1552_s29 + $0x68] sm:$0xff]  ;;  %v529_v42 = vld [vmem:[%s1552_s29 + $0x70] sm:$0xff]  ;;  %v530_v43 = vld [vmem:[%s1552_s29 + $0x78] sm:$0xff] }
  0x68   : > { %1093 = vmatprep.subr.bf16.mxu0 %v1361_v36  ;;  %v1151_v44 = vpack.c.bf16 %v530_v43, %v529_v42  ;;  %v679_v55 = vld [vmem:[#allocation2] sm:$0xff] }
  0x69   : > { %1116 = vmatpush3.bf16.msra.mxu1 %v1115_v63 }
  0x6a   : > { %1117 = vmatprep.subr.bf16.mxu1 %v1361_v36 }
  0x6b   : > { %1095 = vmatpush3.bf16.msra.mxu0 %v1094_v60 }
  0x6c   : > { %1096 = vmatprep.subr.bf16.mxu0 %v1361_v36 }
  0x6d   : > { %1119 = vmatpush3.bf16.msra.mxu1 %v1118_v5 }
  0x6e   : > { %1120 = vmatprep.subr.bf16.mxu1 %v1361_v36 }
  0x6f   : > { %1098 = vmatpush3.bf16.msra.mxu0 %v1097_v2 }
  0x70   : > { %1099 = vmatprep.subr.bf16.mxu0 %v1361_v36 }
  0x71   : > { %1122 = vmatpush3.bf16.msra.mxu1 %v1121_v11 }
  0x72   : > { %1123 = vmatprep.subr.bf16.mxu1 %v1361_v36 }
  0x73   : > { %1101 = vmatpush3.bf16.msra.mxu0 %v1100_v8 }
  0x74   : > { %1102 = vmatprep.subr.bf16.mxu0 %v1361_v36 }
  0x75   : > { %1125 = vmatpush3.bf16.msra.mxu1 %v1124_v15 }
  0x76   : > { %1126 = vmatprep.subr.bf16.mxu1 %v1361_v36 }
  0x77   : > { %1104 = vmatpush3.bf16.msra.mxu0 %v1103_v14 }
  0x78   : > { %1129 = vmatprep.subr.bf16.mxu0 %v1361_v36 }
  0x79   : > { %1128 = vmatpush3.bf16.msra.mxu1 %v1127_v19 }
  0x7a   : > { %1009 = vmatmul.mubr.f32.vlgmr.msra.gmra.mrb[0].mxu0 %v482_v18 }
  0x7b   : > { %1078 = vmatprep.mubr.msk.f32.mxu0 %vm1362_vm0, %v1363_v39  ;;  %1131 = vmatpush3.bf16.msra.mxu0 %v1130_v22  ;;  %v527_v39 = vld [vmem:[%s1552_s29 + $0x60] sm:$0xff] }
  0x7c   : > { %1044 = vmatmul.mubr.f32.vlgmr.msra.gmra.mrb[0].mxu1 %v482_v18  ;;  %1132 = vmatprep.subr.bf16.mxu0 %v1361_v36  ;;  %v1148_v41 = vpack.c.bf16 %v528_v40, %v527_v39 }
  0x7f   : > { %1134 = vmatpush3.bf16.msra.mxu0 %v1133_v25 }
  0x80   : > { %1135 = vmatprep.subr.bf16.mxu0 %v1361_v36 }
  0x83   : > { %1137 = vmatpush3.bf16.msra.mxu0 %v1136_v28 }
  0x84   : > { %1138 = vmatprep.subr.bf16.mxu0 %v1361_v36 }
  0x87   : > { %1140 = vmatpush3.bf16.msra.mxu0 %v1139_v31 }
  0x88   : > { %1141 = vmatprep.subr.bf16.mxu0 %v1361_v36 }
  0x8b   : > { %1143 = vmatpush3.bf16.msra.mxu0 %v1142_v34 }
  0x8c   : > { %1144 = vmatprep.subr.bf16.mxu0 %v1361_v36 }
  0x8f   : > { %1146 = vmatpush3.bf16.msra.mxu0 %v1145_v38 }
  0x90   : > { %1147 = vmatprep.subr.bf16.mxu0 %v1361_v36 }
  0x93   : > { %1149 = vmatpush3.bf16.msra.mxu0 %v1148_v41 }
  0x94   : > { %1150 = vmatprep.subr.bf16.mxu0 %v1361_v36 }
  0x97   : > { %1152 = vmatpush3.bf16.msra.mxu0 %v1151_v44 }
 0x14d   : > { %v597_v45 = vpop.f32.mrb[0].mxu0 }
 0x14e   : > { %v919_v46 = vmul.f32 -1.442695, %v597_v45  ;;  %v1010_v47 = vpop.f32.mrb[1].mxu0 }
 0x14f   : > { %v667_v48 = vpop.f32.mrb[0].mxu1 }
 0x150   : > { %1244 = vpow2.f32 %v919_v46  ;;  %v1045_v49 = vpop.f32.mrb[1].mxu1 }
 0x15a   : > { %v1245_v50 = vpop.eup %1244 }
 0x15b   : > { %v674_v51 = vadd.f32 1.0, %v1245_v50 }
 0x15d   : > { %1246 = vrcp.f32 %v674_v51 }
 0x167   : > { %v1247_v52 = vpop.eup %1246 }
 0x168   : > { %v677_v53 = vmul.f32 %v1247_v52, %v597_v45 }
 0x16a   : > { %v678_v54 = vmul.f32 %v677_v53, %v667_v48 }
 0x16c   : > { %1079 = vmatmul.mubr.f32.vlgmr.msra.gmra.mrb[2].mxu0 %v678_v54 }
 0x23c   : > { %755 = sbr.rel (%p920_p6) target bundleno = 587 (0x24b), region = 120 }
 0x23f   : > { %v746_v56 = vpop.f32.mrb[2].mxu0 }
 0x240   : > { %v750_v36 = vadd.f32 %v746_v56, %v679_v55  ;;  %v1080_v57 = vpop.f32.mrb[3].mxu0 }
 0x242   : > { %751 = vst [vmem:[#allocation2] sm:$0xff] %v750_v36 }
 0x249   : > { %v756_v58 = vld [vmem:[#allocation2] sm:$0xff] }
 0x24a   : > { %757 = vst [vmem:[%s462_s22] sm:$0xff] %v756_v58 }
 0x24b PF: > { %s922_s2 = sshll.u32 %s1346_s21, 7  ;;  %s772_s29 = sshll.u32 %s462_s22, 4  ;;  %s773_s29 = int_to_ptr.vmem [resolvable:$true] %s772_s29 }
 0x24c   : > { %s1646_s28 = scalar_lea.hbm %s1707_s4, %s922_s2  ;;  %s1724_s20 = sand.u32 1, %s1326_s16  }
 0x24d   : > { %s759_s13 = scalar_lea.sflag [#allocation6], %s1724_s20  ;;  %s1248_s14 = scalar_lea.vmem %s773_s29, 128 }
 0x24e   : > { %p1249_p8 = scmp.ne.s32.totalorder %s773_s29, %s1248_s14  ;;  %s1364_s25 = smov [#allocation5]  }
 0x24f   : > { %s1252_s26 = sshll.u32 %s1364_s25, 4  ;;  %s1253_s26 = int_to_ptr.vmem [resolvable:$false] %s1252_s26 }
 0x250   : > { %p1250_p9 = pnand %p1249_p8, %p1462_p7  ;;  %s1254_s30 = scalar_lea.vmem %s1253_s26, 256 }
 0x251   : > { %p1255_p11 = scmp.lt.s32.totalorder %s773_s29, %s1253_s26  ;;  %p1256_p13 = scmp.lt.s32.totalorder %s1254_s30, %s1248_s14 }
 0x252   : > { %p1251_p10 = pneg %p1250_p9 }
 0x253   : > { %p1257_p0 = por %p1256_p13, %p1255_p11 }
 0x255   : > { %p1258_p1 = pnand %p1257_p0, %p1251_p10 }
 0x257   : > { %1261 = shalt.err (!%p1258_p1)
}
 0x258   : > { %s1262_s21 = scalar_lea.hbm %s1646_s28, 128  ;;  %s1266_s8 = scalar_lea.hbm %s1707_s4, 512 }
 0x259   : > { %p1263_p2 = scmp.ne.s32.totalorder %s1646_s28, %s1262_s21  ;;  %p1267_p5 = scmp.lt.u32.totalorder %s1646_s28, %s1707_s4 }
 0x25a   : > { %p1268_p6 = scmp.lt.u32.totalorder %s1266_s8, %s1262_s21  ;;  %p1270_p9 = scmp.lt.u32.totalorder %s1262_s21, %s1646_s28 }
 0x25b   : > { %p1264_p3 = pnand %p1263_p2, %p1462_p7 }
 0x25c   : > { %p1269_p8 = por %p1268_p6, %p1267_p5 }
 0x25d   : > { %p1265_p4 = pneg %p1264_p3 }
 0x25e   : > { %p1271_p10 = por %p1270_p9, %p1269_p8 }
 0x260   : > { %p1272_p11 = pnand %p1271_p10, %p1265_p4 }
 0x262   : > { %1275 = shalt.err (!%p1272_p11)
}
 0x263   : > { %1153 = dma.vmem_to_hbm [thread:$0]  (%p1462_p7), %s773_s29, 128, %s1646_s28, %s759_s13  }
 0x264 PF: > { %p1159_p13 = scmp.ge.s32.totalorder %s1358_s24, 2  ;;  %s784_s18 = sand.u32 1, %s1322_s15  }
 0x265   : > { %s785_s6 = scalar_lea.sflag [#allocation6], %s784_s18 }
 0x266   : > { %p1156_p0 = pnand %p1159_p13, %p1470_p12 }
 0x268   : > { %1317 = dma.done.wait (!%p1156_p0), %s785_s6, 128  }
 0x269   : > { %1319 = vsyncadd (!%p1156_p0), %s785_s6, 4294967168  ;;  %s17_s24 = sadd.s32 1, %s1358_s24   ;;  %s1725_s20 = sld [smem:[#allocation8_spill]] }
 0x26a   : > { %p14_p1 = scmp.ge.s32.totalorder %s17_s24, 10   ;;  %s1726_s21 = sld [smem:[#allocation9_spill]] }
 0x26b   : > { %s1727_s22 = sld [smem:[#allocation10_spill]]  ;;  %s1728_s23 = sld [smem:[#allocation11_spill]] }
 0x26c   : > { %s1729_s15 = smov %s1326_s16  ;;  %s1730_s16 = smov %s1330_s17 }
 0x26d   : > { %s1731_s17 = smov %s1475_s11  ;;  %s1732_s18 = smov %s1338_s19 }
 0x26e   : > { %s1733_s19 = smov %s1478_s12  ;;  %16 = sbr.rel (!%p14_p1) target bundleno = 9 (0x9), region = 174 }
 0x275   :  { %790 = vsyncpa [#allocation6], 1 }
 0x276   :  { %792 = vsyncpa [#allocation6 + $0x1], 1 }

</bundles_post_ra>
